<compile_context>
chip_gen: v5e
topology: v5e:2x2
jax: 0.10.0
libtpu: 0.0.40
codegen_flags: <defaults>
</compile_context>

<pallas_src>
import functools

import jax
import jax.numpy as jnp
from jax.experimental import pallas as pl
from jax.experimental.pallas import tpu as pltpu


def _mse_kernel(x_ref, y_ref, o_ref, acc_ref, *,
                rows_total, tile_r, n_blocks, acc_rows, need_mask):
    """Accumulate sum((x - y)^2) per slab; emit the slab partial on the last step."""
    j = pl.program_id(1)
    lanes = x_ref.shape[-1]

    @pl.when(j == 0)
    def _():
        acc_ref[...] = jnp.zeros_like(acc_ref)

    d = x_ref[...].astype(jnp.float32) - y_ref[...].astype(jnp.float32)

    def partial_sum(v):
        # (tile_r, lanes) -> (acc_rows, lanes): vreg-aligned VPU adds only
        # (the reshape splits the sublane dim exactly at the (8,128) tile
        # boundary, so it is layout-preserving).
        if acc_rows == tile_r:
            return v
        return jnp.sum(v.reshape(tile_r // acc_rows, acc_rows, lanes), axis=0)

    if need_mask:
        slab = pl.program_id(0)
        block_idx = slab * pl.num_programs(1) + j
        is_tail = block_idx >= n_blocks - 1

        @pl.when(jnp.logical_not(is_tail))
        def _():
            # Steady state: no mask arithmetic at all.
            acc_ref[...] += partial_sum(d * d)

        @pl.when(is_tail)
        def _():
            # Last real block (possibly partial) and phantom clamped blocks:
            # zero invalid rows in the DIFF before squaring so garbage
            # (NaN/Inf) from clamped DMA windows never reaches the accumulator.
            row_ids = block_idx * tile_r + jax.lax.broadcasted_iota(
                jnp.int32, d.shape, 0)
            dm = jnp.where(row_ids < rows_total, d, 0.0)
            acc_ref[...] += partial_sum(dm * dm)
    else:
        acc_ref[...] += partial_sum(d * d)

    @pl.when(j == pl.num_programs(1) - 1)
    def _():
        # Single cross-lane/sublane reduce per slab, done once on (acc_rows, lanes).
        o_ref[...] = jnp.broadcast_to(jnp.sum(acc_ref[...]), o_ref.shape)


def mse_loss(x, y, *, target_block_bytes=6 * 1024 * 1024):
    """Pallas equivalent of torch.nn.MSELoss(reduction='mean')(x.flatten(1), y.flatten(1))."""
    assert x.shape == y.shape, "MSELoss expects matching shapes"
    total_n = x.size  # mean is over ALL elements
    itemsize = max(x.dtype.itemsize, y.dtype.itemsize)

    xf = x.reshape(-1)  # free reshape (contiguous); flatten(1) vs flatten() same mean
    yf = y.reshape(-1)
    n = xf.shape[0]

    # Tiny inputs (< one 128-lane row): not worth a kernel launch.
    if n < 128:
        d = xf.astype(jnp.float32) - yf.astype(jnp.float32)
        return jnp.sum(d * d) / jnp.float32(total_n)

    # The kernel runs on the 128-aligned prefix; a <128-element ragged tail is
    # folded in on the wrapper side (no full-tensor jnp.pad copy).
    n_main = n - (n % 128)
    if n_main != n:
        xt = xf[n_main:].astype(jnp.float32)
        yt = yf[n_main:].astype(jnp.float32)
        tail_sum = jnp.sum((xt - yt) * (xt - yt))
        xf = xf[:n_main]
        yf = yf[:n_main]
    else:
        tail_sum = jnp.float32(0.0)

    # Lane-dense 2D view: lanes is the largest nice multiple of 128 dividing n_main.
    lanes = 128
    for cand in (2048, 1024, 512, 256, 128):
        if n_main % cand == 0:
            lanes = cand
            break
    rows = n_main // lanes
    x2d = xf.reshape(rows, lanes)  # free reshape of a contiguous buffer
    y2d = yf.reshape(rows, lanes)

    # ~target_block_bytes per input block (multiple of 8 rows); full extent if
    # rows is small.
    tile_r = max(8, (target_block_bytes // (lanes * itemsize)) // 8 * 8)
    if rows <= tile_r:
        tile_r = rows  # full-extent block is always legal
    n_blocks = pl.cdiv(rows, tile_r)
    acc_rows = 8 if tile_r % 8 == 0 else tile_r  # tiny-rows case keeps full acc

    # Slab split -> 'parallel' axis shards across the two v7x TensorCores
    # (balanced to within one block); only enabled when there are enough
    # blocks so the at-most-one phantom block is negligible.  On v5e/v6e it is
    # just a cheap outer loop.
    num_slabs = 2 if n_blocks >= 4 else 1
    steps = pl.cdiv(n_blocks, num_slabs)
    need_mask = (num_slabs * steps * tile_r) != rows

    def in_map(c, j):
        bi = c * steps + j
        return (jnp.minimum(bi, n_blocks - 1), 0)  # clamp phantom tail blocks

    kernel = functools.partial(
        _mse_kernel, rows_total=rows, tile_r=tile_r, n_blocks=n_blocks,
        acc_rows=acc_rows, need_mask=need_mask)

    out = pl.pallas_call(
        kernel,
        out_shape=jax.ShapeDtypeStruct((num_slabs, 8, 128), jnp.float32),
        grid_spec=pltpu.PrefetchScalarGridSpec(
            num_scalar_prefetch=0,
            grid=(num_slabs, steps),
            in_specs=[
                pl.BlockSpec((tile_r, lanes), in_map),
                pl.BlockSpec((tile_r, lanes), in_map),
            ],
            out_specs=pl.BlockSpec((1, 8, 128), lambda c, j: (c, 0, 0)),
            scratch_shapes=[pltpu.VMEM((acc_rows, lanes), jnp.float32)],
        ),
        compiler_params=pltpu.CompilerParams(
            dimension_semantics=("parallel", "arbitrary"),
            # 2 inputs x 2 pipeline buffers x ~6 MiB + (8, lanes) acc ~= 24 MiB;
            # 48 MiB clears v5e's 16 MiB default scoped limit and stays under
            # v7x's 64 MiB physical VMEM per TensorCore.
            vmem_limit_bytes=48 * 1024 * 1024,
        ),
        cost_estimate=pl.CostEstimate(
            flops=3 * total_n,
            transcendentals=0,
            bytes_accessed=total_n * (x.dtype.itemsize + y.dtype.itemsize),
        ),
    )(x2d, y2d)

    partials = out[:, 0, 0]  # one partial sum per slab
    return (jnp.sum(partials) + tail_sum) / jnp.float32(total_n)


if __name__ == "__main__":
    key = jax.random.PRNGKey(0)
    kx, ky, kx2, ky2, kx3, ky3 = jax.random.split(key, 6)

    # Small NCHW shapes consistent with the module's usage (flow tensors).
    x = jax.random.normal(kx, (2, 4, 16, 16), dtype=jnp.float32)
    y = jax.random.normal(ky, (2, 4, 16, 16), dtype=jnp.float32)
    loss = mse_loss(x, y)
    jax.block_until_ready(loss)
    ref = jnp.mean((x - y) ** 2)
    assert jnp.allclose(loss, ref, rtol=1e-5, atol=1e-6), (loss, ref)

    # Multi-block / 2-slab / phantom-block / gated-tail-mask path:
    # tiny target block size -> 5 row blocks -> 2 slabs x 3 steps with one
    # clamped phantom block that must be fully masked out.
    x2 = jax.random.normal(kx2, (4, 4, 80, 64), dtype=jnp.float32)
    y2 = jax.random.normal(ky2, (4, 4, 80, 64), dtype=jnp.float32)
    loss2 = mse_loss(x2, y2, target_block_bytes=64 * 1024)
    jax.block_until_ready(loss2)
    ref2 = jnp.mean((x2 - y2) ** 2)
    assert jnp.allclose(loss2, ref2, rtol=1e-5, atol=1e-6), (loss2, ref2)

    # Non-128-aligned element count: kernel on the aligned prefix, ragged
    # <128-element tail folded in by the wrapper (no full-tensor pad copy).
    x3 = jax.random.normal(kx3, (2, 3, 5, 7), dtype=jnp.float32)
    y3 = jax.random.normal(ky3, (2, 3, 5, 7), dtype=jnp.float32)
    loss3 = mse_loss(x3, y3)
    jax.block_until_ready(loss3)
    ref3 = jnp.mean((x3 - y3) ** 2)
    assert jnp.allclose(loss3, ref3, rtol=1e-5, atol=1e-6), (loss3, ref3)

    print("KERNEL_OK")
</pallas_src>

<mosaic_0001>
module attributes {stable_mosaic.version = 11 : i64} {
  func.func @_mse_kernel(%arg0: i32, %arg1: i32, %arg2: memref<1x2048xf32, #tpu.memory_space<vmem>>, %arg3: memref<1x2048xf32, #tpu.memory_space<vmem>>, %arg4: memref<1x8x128xf32, #tpu.memory_space<vmem>>, %arg5: memref<1x2048xf32, #tpu.memory_space<vmem>>) attributes {dimension_semantics = [#tpu.dimension_semantics<parallel>, #tpu.dimension_semantics<arbitrary>], iteration_bounds = array<i64: 1, 1>, scalar_prefetch = 0 : i64, scratch_operands = 1 : i64, tpu.core_type = #tpu.core_type<tc>, window_params = [{transform_indices = @transform_0, window_bounds = array<i64: 1, 2048>}, {transform_indices = @transform_1, window_bounds = array<i64: 1, 2048>}, {transform_indices = @transform_2, window_bounds = array<i64: 1, 8, 128>}]} {
    %c0_i32 = arith.constant 0 : i32
    %0 = arith.cmpi eq, %arg1, %c0_i32 : i32
    %1 = arith.extui %0 : i1 to i32
    %c0_i32_0 = arith.constant 0 : i32
    %2 = arith.cmpi ne, %1, %c0_i32_0 : i32
    scf.if %2 {
      %cst = arith.constant 0.000000e+00 : f32
      %13 = vector.broadcast %cst : f32 to vector<1x2048xf32>
      %c0_10 = arith.constant 0 : index
      %c0_11 = arith.constant 0 : index
      %14 = vector.load %arg5[%c0_10, %c0_11] : memref<1x2048xf32, #tpu.memory_space<vmem>>, vector<1x2048xf32>
      tpu.vector_store %arg5[%c0_10, %c0_11], %13 {strides = array<i32>} : memref<1x2048xf32, #tpu.memory_space<vmem>>, vector<1x2048xf32>,
    } else {
    }
    %c0 = arith.constant 0 : index
    %c0_1 = arith.constant 0 : index
    %3 = vector.load %arg2[%c0, %c0_1] : memref<1x2048xf32, #tpu.memory_space<vmem>>, vector<1x2048xf32>
    %c0_2 = arith.constant 0 : index
    %c0_3 = arith.constant 0 : index
    %4 = vector.load %arg3[%c0_2, %c0_3] : memref<1x2048xf32, #tpu.memory_space<vmem>>, vector<1x2048xf32>
    %5 = arith.subf %3, %4 : vector<1x2048xf32>
    %c0_4 = arith.constant 0 : index
    %c0_5 = arith.constant 0 : index
    %6 = vector.load %arg5[%c0_4, %c0_5] : memref<1x2048xf32, #tpu.memory_space<vmem>>, vector<1x2048xf32>
    %7 = arith.mulf %5, %5 : vector<1x2048xf32>
    %8 = arith.addf %6, %7 : vector<1x2048xf32>
    %c0_6 = arith.constant 0 : index
    %c0_7 = arith.constant 0 : index
    %9 = vector.load %arg5[%c0_6, %c0_7] : memref<1x2048xf32, #tpu.memory_space<vmem>>, vector<1x2048xf32>
    tpu.vector_store %arg5[%c0_6, %c0_7], %8 {strides = array<i32>} : memref<1x2048xf32, #tpu.memory_space<vmem>>, vector<1x2048xf32>,
    %c0_i32_8 = arith.constant 0 : i32
    %10 = arith.cmpi eq, %arg1, %c0_i32_8 : i32
    %11 = arith.extui %10 : i1 to i32
    %c0_i32_9 = arith.constant 0 : i32
    %12 = arith.cmpi ne, %11, %c0_i32_9 : i32
    scf.if %12 {
      %c0_10 = arith.constant 0 : index
      %c0_11 = arith.constant 0 : index
      %13 = vector.load %arg5[%c0_10, %c0_11] : memref<1x2048xf32, #tpu.memory_space<vmem>>, vector<1x2048xf32>
      %14 = vector.shape_cast %13 : vector<1x2048xf32> to vector<1x1x2048xf32>
      %cst = arith.constant dense<0.000000e+00> : vector<1xf32>
      %15 = vector.multi_reduction <add>, %14, %cst [1, 2] : vector<1x1x2048xf32> to vector<1xf32>
      %16 = vector.shape_cast %15 : vector<1xf32> to vector<1x1x1xf32>
      %17 = vector.extract %16[0, 0, 0] : f32 from vector<1x1x1xf32>
      %18 = vector.broadcast %17 : f32 to vector<1x8x128xf32>
      %c0_12 = arith.constant 0 : index
      %c0_13 = arith.constant 0 : index
      %c0_14 = arith.constant 0 : index
      %19 = vector.load %arg4[%c0_12, %c0_13, %c0_14] : memref<1x8x128xf32, #tpu.memory_space<vmem>>, vector<1x8x128xf32>
      tpu.vector_store %arg4[%c0_12, %c0_13, %c0_14], %18 {strides = array<i32>} : memref<1x8x128xf32, #tpu.memory_space<vmem>>, vector<1x8x128xf32>,
    } else {
    }
    return
  }
  func.func @transform_0(%arg0: i32, %arg1: i32) -> (i32, i32) {
    %c1_i32 = arith.constant 1 : i32
    %0 = arith.muli %arg0, %c1_i32 : i32
    %1 = arith.addi %0, %arg1 : i32
    %c0_i32 = arith.constant 0 : i32
    %2 = arith.minsi %1, %c0_i32 : i32
    %c0_i32_0 = arith.constant 0 : i32
    %c0_i32_1 = arith.constant 0 : i32
    return %2, %c0_i32_0 : i32, i32
  }
  func.func @transform_1(%arg0: i32, %arg1: i32) -> (i32, i32) {
    %c1_i32 = arith.constant 1 : i32
    %0 = arith.muli %arg0, %c1_i32 : i32
    %1 = arith.addi %0, %arg1 : i32
    %c0_i32 = arith.constant 0 : i32
    %2 = arith.minsi %1, %c0_i32 : i32
    %c0_i32_0 = arith.constant 0 : i32
    %c0_i32_1 = arith.constant 0 : i32
    return %2, %c0_i32_0 : i32, i32
  }
  func.func @transform_2(%arg0: i32, %arg1: i32) -> (i32, i32, i32) {
    %c0_i32 = arith.constant 0 : i32
    %c0_i32_0 = arith.constant 0 : i32
    %c0_i32_1 = arith.constant 0 : i32
    return %arg0, %c0_i32, %c0_i32_0 : i32, i32, i32
  }
}

</mosaic_0001>

<bundles_post_ra>
// kernel: tpu_custom_call.1
= control target key start
LH: loop header
LB: loop body
LE: loop exit
PB: predicated region body
PF: predicated region fallthrough
CT: control target
= control target key end

     0   :  { %7 = vsyncpa [#allocation4], 0  ;;  %s306_s0 = inlined_call_operand.hbm [shape: f32[1,2048], index: 0, kind: input, shape index: {}]   ;;  %s307_s1 = inlined_call_operand.hbm [shape: f32[1,2048], index: 1, kind: input, shape index: {}]   ;;  %s308_s2 = inlined_call_operand.hbm [shape: f32[1,8,128], index: 2, kind: output, shape index: {}]  }
   0x1   :  { %8 = vsyncpa [#allocation7], 0 }
   0x2   :  { %9 = vsyncpa [#allocation5], 0  ;;  %s20_s11 = sshll.u32 %s306_s0, 4  ;;  %s263_s12 = smov [#allocation3]   ;;  %s21_s11 = int_to_ptr.hbm [resolvable:$true] %s20_s11 }
   0x3   :  { %s22_s13 = sshll.u32 %s263_s12, 4  ;;  %s36_s16 = sshll.u32 %s307_s1, 4  ;;  %s23_s13 = int_to_ptr.vmem [resolvable:$true] %s22_s13  ;;  %s37_s16 = int_to_ptr.hbm [resolvable:$true] %s36_s16 }
   0x4   :  { %25 = dma.hbm_to_vmem [thread:$0]  %s21_s11, 256, %s23_s13, [#allocation4]  }
   0x5   :  { %s264_s17 = smov [#allocation6]  }
   0x6   :  { %s38_s18 = sshll.u32 %s264_s17, 4  ;;  %s39_s18 = int_to_ptr.vmem [resolvable:$true] %s38_s18 }
   0x7   :  { %41 = dma.hbm_to_vmem [thread:$0]  %s37_s16, 256, %s39_s18, [#allocation7]  }
   0x8   :  { %257 = dma.done.wait [#allocation4], 256  }
   0x9   :  { %258 = vsyncadd [#allocation4], 4294967040 }
   0xa   :  { %259 = dma.done.wait [#allocation7], 256  }
   0xb   :  { %260 = vsyncadd [#allocation7], 4294967040  ;;  %v62_v0 = vld [vmem:[#allocation3] sm:$0xff]  ;;  %v64_v1 = vld [vmem:[#allocation6] sm:$0xff]  ;;  %vm115_vm0 = vcmask 1040384   ;;  %s265_s0 = smov [#allocation8]  }
   0xc   :  { %v66_v2 = vsub.f32 %v62_v0, %v64_v1  ;;  %v63_v4 = vld [vmem:[#allocation3 + $0x8] sm:$0xff]  ;;  %v65_v5 = vld [vmem:[#allocation6 + $0x8] sm:$0xff]  ;;  %s163_s1 = sshll.u32 %s265_s0, 4  ;;  %s165_s21 = sshll.u32 %s308_s2, 4  ;;  %s164_s1 = int_to_ptr.vmem [resolvable:$true] %s163_s1  ;;  %s166_s21 = int_to_ptr.hbm [resolvable:$true] %s165_s21 }
   0xd   :  { %v67_v10 = vsub.f32 %v63_v4, %v65_v5 }
   0xe   :  { %v70_v3 = vmul.f32 %v66_v2, %v66_v2 }
   0xf   :  { %v71_v19 = vmul.f32 %v67_v10, %v67_v10 }
  0x10   :  { %v83_v6 = vperm.slane %v70_v3, 0  ;;  %v84_v7 = vperm.slane %v70_v3, 1  ;;  %v85_v8 = vperm.slane %v70_v3, 2  ;;  %v86_v9 = vperm.slane %v70_v3, 3 }
  0x11   :  { %v87_v11 = vperm.slane %v70_v3, 4  ;;  %v88_v16 = vperm.slane %v70_v3, 5  ;;  %v89_v20 = vperm.slane %v70_v3, 6  ;;  %v90_v23 = vperm.slane %v70_v3, 7 }
  0x12   :  { %v116_v12 = vsel %vm115_vm0, %v83_v6, 0.0  ;;  %v117_v13 = vsel %vm115_vm0, %v84_v7, 0.0  ;;  %v119_v14 = vsel %vm115_vm0, %v85_v8, 0.0  ;;  %v121_v17 = vsel %vm115_vm0, %v86_v9, 0.0 }
  0x13   :  { %v118_v15 = vadd.f32 %v117_v13, %v116_v12  ;;  %v123_v21 = vsel %vm115_vm0, %v87_v11, 0.0  ;;  %v125_v24 = vsel %vm115_vm0, %v88_v16, 0.0  ;;  %v91_v26 = vperm.slane %v71_v19, 0 }
  0x14   :  { %v127_v27 = vsel %vm115_vm0, %v89_v20, 0.0  ;;  %v92_v29 = vperm.slane %v71_v19, 1  ;;  %v129_v30 = vsel %vm115_vm0, %v90_v23, 0.0  ;;  %v93_v32 = vperm.slane %v71_v19, 2 }
  0x15   :  { %v120_v18 = vadd.f32 %v119_v14, %v118_v15  ;;  %v131_v33 = vsel %vm115_vm0, %v91_v26, 0.0  ;;  %v94_v35 = vperm.slane %v71_v19, 3  ;;  %v95_v38 = vperm.slane %v71_v19, 4 }
  0x16   :  { %v133_v36 = vsel %vm115_vm0, %v92_v29, 0.0  ;;  %v135_v39 = vsel %vm115_vm0, %v93_v32, 0.0  ;;  %v96_v41 = vperm.slane %v71_v19, 5  ;;  %v97_v44 = vperm.slane %v71_v19, 6 }
  0x17   :  { %v122_v22 = vadd.f32 %v121_v17, %v120_v18  ;;  %v137_v42 = vsel %vm115_vm0, %v94_v35, 0.0  ;;  %v139_v45 = vsel %vm115_vm0, %v95_v38, 0.0  ;;  %v98_v47 = vperm.slane %v71_v19, 7 }
  0x18   :  { %v141_v48 = vsel %vm115_vm0, %v96_v41, 0.0  ;;  %v143_v50 = vsel %vm115_vm0, %v97_v44, 0.0 }
  0x19   :  { %v124_v25 = vadd.f32 %v123_v21, %v122_v22  ;;  %v145_v52 = vsel %vm115_vm0, %v98_v47, 0.0 }
  0x1b   :  { %v126_v28 = vadd.f32 %v125_v24, %v124_v25 }
  0x1d   :  { %v128_v31 = vadd.f32 %v127_v27, %v126_v28 }
  0x1f   :  { %v130_v34 = vadd.f32 %v129_v30, %v128_v31 }
  0x21   :  { %v132_v37 = vadd.f32 %v131_v33, %v130_v34 }
  0x23   :  { %v134_v40 = vadd.f32 %v133_v36, %v132_v37 }
  0x25   :  { %v136_v43 = vadd.f32 %v135_v39, %v134_v40 }
  0x27   :  { %v138_v46 = vadd.f32 %v137_v42, %v136_v43 }
  0x29   :  { %v140_v49 = vadd.f32 %v139_v45, %v138_v46 }
  0x2b   :  { %v142_v51 = vadd.f32 %v141_v48, %v140_v49 }
  0x2d   :  { %v144_v53 = vadd.f32 %v143_v50, %v142_v51 }
  0x2f   :  { %v146_v54 = vadd.f32 %v145_v52, %v144_v53 }
  0x31   :  { %147 = vadd.xlane.f32.xlu0 %v146_v54 }
  0xa4   :  { %v148_v55 = vpop.xlane.xlu0 %147 }
  0xa5   :  { %v149_v56 = vrot.slane %v148_v55, 4 }
  0xa7   :  { %v150_v57 = vadd.f32 %v149_v56, %v148_v55 }
  0xa9   :  { %v151_v58 = vrot.slane %v150_v57, 2 }
  0xab   :  { %v152_v59 = vadd.f32 %v151_v58, %v150_v57 }
  0xad   :  { %v153_v60 = vrot.slane %v152_v59, 1 }
  0xaf   :  { %v154_v61 = vadd.f32 %v153_v60, %v152_v59 }
  0xb1   :  { %180 = vpush %v154_v61 }
  0xe2   :  { %s181_s22 = spop %180 }
  0xe3   :  { %v156_v62 = vstv %s181_s22 }
  0xe4   :  { %157 = vst [vmem:[#allocation8] sm:$0xff] %v156_v62 }
  0xe5   :  { %168 = dma.vmem_to_hbm [thread:$0]  %s164_s1, 128, %s166_s21, [#allocation5]  }
  0xe6   :  { %261 = dma.done.wait [#allocation5], 128  }
  0xe7   :  { %262 = vsyncadd [#allocation5], 4294967168 }
  0xe8   :  { %173 = vsyncpa [#allocation4], 1 }
  0xe9   :  { %174 = vsyncpa [#allocation7], 1 }
  0xea   :  { %175 = vsyncpa [#allocation5], 1 }

</bundles_post_ra>
